<compile_context>
chip_gen: v7x
topology: tpu7x:2x2x1
jax: 0.10.0
libtpu: 0.0.40
codegen_flags: <defaults>
</compile_context>

<pallas_src>
import functools

import jax
import jax.numpy as jnp
from jax.experimental import pallas as pl
from jax.experimental.pallas import tpu as pltpu


def basic_block_ic_kernel(mask_ref, x_ref, w1_ref, w2_ref,
                          s1_ref, b1_ref, s2_ref, b2_ref,
                          o_ref, taps_ref, *, H, W, mm_dtype):
    """One grid step: `block_n` images, layout (block_n, C, H*W)."""
    HW = H * W
    block_n = x_ref.shape[0]

    def conv3x3(a, w_ref):
        # a: (Cin, HW) f32.  Build the 9 zero-padded 3x3 taps via lane rotation
        # + border mask, write them contiguously into the im2col scratch
        # (9*Cin, HW), then do a single MXU matmul (Cout, 9*Cin) x (9*Cin, HW).
        rows = a.shape[0]
        t = 0
        for dy in range(3):
            for dx in range(3):
                off = (dy - 1) * W + (dx - 1)
                if off == 0:
                    tap = a                                     # center tap
                else:
                    tap = pltpu.roll(a, shift=(-off) % HW, axis=1) * mask_ref[t]
                taps_ref[pl.ds(t * rows, rows), :] = tap
                t += 1
        return jnp.dot(w_ref[...].astype(mm_dtype),
                       taps_ref[...].astype(mm_dtype),
                       preferred_element_type=jnp.float32)      # (Cout, HW) f32

    for n in range(block_n):                                    # static unroll
        # ---- ic1(relu(x)): relu -> folded BatchNorm (dropout == identity) ---
        a1 = jnp.maximum(x_ref[n], 0.0) * s1_ref[...] + b1_ref[...]
        out1 = conv3x3(a1, w1_ref)
        # ---- ic2(relu(out1)) ----
        a2 = jnp.maximum(out1, 0.0) * s2_ref[...] + b2_ref[...]
        out2 = conv3x3(a2, w2_ref)
        # ---- identity shortcut: re-read x_ref (short live range) ----
        o_ref[n] = (out2 + x_ref[n]).astype(o_ref.dtype)


def fold_bn(gamma, beta, running_mean, running_var, eps=1e-5):
    scale = gamma / jnp.sqrt(running_var + eps)
    bias = beta - running_mean * scale
    return scale, bias


def _border_masks(H, W):
    """(9, 1, H*W) 0/1 mask of valid (in-bounds) source pixels per 3x3 tap."""
    ys = jnp.arange(H)[:, None]
    xs = jnp.arange(W)[None, :]
    masks = []
    for dy in range(3):
        for dx in range(3):
            valid = ((ys + dy - 1 >= 0) & (ys + dy - 1 < H) &
                     (xs + dx - 1 >= 0) & (xs + dx - 1 < W))
            masks.append(valid.reshape(1, H * W))
    return jnp.stack(masks, axis=0).astype(jnp.float32)


def basic_block_ic(x_nchw, params, *, block_n=1, mm_dtype=jnp.bfloat16):
    """x_nchw: (N, C, H, W) float32.  Returns (N, C, H, W)."""
    N, C, H, W = x_nchw.shape
    HW = H * W
    Cout = params["conv1_w"].shape[0]
    # Identity shortcut only (stride == 1, in_planes == planes).
    assert params["conv1_w"].shape[1] == C
    assert params["conv2_w"].shape == (Cout, Cout, 3, 3)
    assert Cout == C, "identity shortcut requires in_planes == planes"
    assert N % block_n == 0

    # Lane-dense layout: (N, C, H*W) -> last (lane) dim is H*W.
    x = x_nchw.reshape(N, C, HW)

    # Conv weights (Cout, Cin, 3, 3) -> im2col matrices (Cout, 9*Cin), bf16.
    w1m = jnp.transpose(params["conv1_w"], (0, 2, 3, 1)).reshape(Cout, 9 * C)
    w2m = jnp.transpose(params["conv2_w"], (0, 2, 3, 1)).reshape(Cout, 9 * Cout)
    w1m = w1m.astype(mm_dtype)
    w2m = w2m.astype(mm_dtype)

    s1, b1 = fold_bn(params["bn1_gamma"], params["bn1_beta"],
                     params["bn1_mean"], params["bn1_var"])
    s2, b2 = fold_bn(params["bn2_gamma"], params["bn2_beta"],
                     params["bn2_mean"], params["bn2_var"])
    s1 = s1.reshape(C, 1);    b1 = b1.reshape(C, 1)
    s2 = s2.reshape(Cout, 1); b2 = b2.reshape(Cout, 1)

    mask = _border_masks(H, W)                                  # (9, 1, HW)

    kernel = functools.partial(basic_block_ic_kernel, H=H, W=W,
                               mm_dtype=mm_dtype)

    out = pl.pallas_call(
        kernel,
        out_shape=jax.ShapeDtypeStruct((N, Cout, HW), x.dtype),
        grid_spec=pltpu.PrefetchScalarGridSpec(
            num_scalar_prefetch=0,
            grid=(N // block_n,),
            in_specs=[
                pl.BlockSpec((9, 1, HW), lambda n: (0, 0, 0)),        # masks
                pl.BlockSpec((block_n, C, HW), lambda n: (n, 0, 0)),  # x
                pl.BlockSpec((Cout, 9 * C), lambda n: (0, 0)),        # w1 (im2col)
                pl.BlockSpec((Cout, 9 * Cout), lambda n: (0, 0)),     # w2 (im2col)
                pl.BlockSpec((C, 1), lambda n: (0, 0)),               # s1
                pl.BlockSpec((C, 1), lambda n: (0, 0)),               # b1
                pl.BlockSpec((Cout, 1), lambda n: (0, 0)),            # s2
                pl.BlockSpec((Cout, 1), lambda n: (0, 0)),            # b2
            ],
            out_specs=pl.BlockSpec((block_n, Cout, HW),
                                   lambda n: (n, 0, 0)),              # lane-dense
            scratch_shapes=[
                pltpu.VMEM((9 * C, HW), jnp.float32),                 # im2col taps
            ],
        ),
        compiler_params=pltpu.CompilerParams(
            dimension_semantics=("parallel",),
            vmem_limit_bytes=32 * 1024 * 1024),
    )(mask, x, w1m, w2m, s1, b1, s2, b2)

    return out.reshape(N, Cout, H, W)


def ref_basic_block_ic(x, params, mm_dtype=jnp.float32):
    """Pure-JAX reference with the same folded-BN inference semantics."""
    s1, b1 = fold_bn(params["bn1_gamma"], params["bn1_beta"],
                     params["bn1_mean"], params["bn1_var"])
    s2, b2 = fold_bn(params["bn2_gamma"], params["bn2_beta"],
                     params["bn2_mean"], params["bn2_var"])

    def conv(a, w):
        return jax.lax.conv_general_dilated(
            a.astype(mm_dtype), w.astype(mm_dtype),
            window_strides=(1, 1), padding=((1, 1), (1, 1)),
            dimension_numbers=("NCHW", "OIHW", "NCHW"),
            preferred_element_type=jnp.float32)

    a1 = jnp.maximum(x, 0.0) * s1[None, :, None, None] + b1[None, :, None, None]
    out1 = conv(a1, params["conv1_w"])
    a2 = jnp.maximum(out1, 0.0) * s2[None, :, None, None] + b2[None, :, None, None]
    out2 = conv(a2, params["conv2_w"])
    return out2 + x


def make_params(key, in_planes, planes):
    ks = jax.random.split(key, 8)
    return {
        "conv1_w": 0.1 * jax.random.normal(ks[0], (planes, in_planes, 3, 3),
                                           jnp.float32),
        "conv2_w": 0.1 * jax.random.normal(ks[1], (planes, planes, 3, 3),
                                           jnp.float32),
        "bn1_gamma": 1.0 + 0.1 * jax.random.normal(ks[2], (in_planes,), jnp.float32),
        "bn1_beta": 0.1 * jax.random.normal(ks[3], (in_planes,), jnp.float32),
        "bn1_mean": 0.1 * jax.random.normal(ks[4], (in_planes,), jnp.float32),
        "bn1_var": jnp.abs(1.0 + 0.1 * jax.random.normal(ks[5], (in_planes,),
                                                         jnp.float32)),
        "bn2_gamma": 1.0 + 0.1 * jax.random.normal(ks[6], (planes,), jnp.float32),
        "bn2_beta": 0.1 * jax.random.normal(ks[7], (planes,), jnp.float32),
        "bn2_mean": jnp.zeros((planes,), jnp.float32),
        "bn2_var": jnp.ones((planes,), jnp.float32),
    }


if __name__ == "__main__":
    key = jax.random.PRNGKey(0)
    kx, kp = jax.random.split(key)

    N, C, H, W = 2, 4, 16, 16          # in_planes == planes == 4, stride == 1
    x = jax.random.normal(kx, (N, C, H, W), jnp.float32)
    params = make_params(kp, in_planes=C, planes=C)

    out = basic_block_ic(x, params)    # bf16 MXU operands, f32 accumulation
    jax.block_until_ready(out)
    assert out.shape == (N, C, H, W)

    # Sanity check against a pure-JAX reference computed with identically
    # bf16-rounded conv operands (isolates kernel-logic errors from the
    # intentional mixed-precision choice).
    ref = ref_basic_block_ic(x, params, mm_dtype=jnp.bfloat16)
    assert jnp.allclose(out, ref, atol=1e-2, rtol=1e-2), \
        float(jnp.max(jnp.abs(out - ref)))
    print("KERNEL_OK")
</pallas_src>

<mosaic_0001>
module attributes {stable_mosaic.version = 11 : i64} {
  func.func @basic_block_ic_kernel(%arg0: i32, %arg1: memref<9x1x256xf32, #tpu.memory_space<vmem>>, %arg2: memref<1x4x256xf32, #tpu.memory_space<vmem>>, %arg3: memref<4x36xbf16, #tpu.memory_space<vmem>>, %arg4: memref<4x36xbf16, #tpu.memory_space<vmem>>, %arg5: memref<4x1xf32, #tpu.memory_space<vmem>>, %arg6: memref<4x1xf32, #tpu.memory_space<vmem>>, %arg7: memref<4x1xf32, #tpu.memory_space<vmem>>, %arg8: memref<4x1xf32, #tpu.memory_space<vmem>>, %arg9: memref<1x4x256xf32, #tpu.memory_space<vmem>>, %arg10: memref<36x256xf32, #tpu.memory_space<vmem>>) attributes {dimension_semantics = [#tpu.dimension_semantics<parallel>], iteration_bounds = array<i64: 2>, scalar_prefetch = 0 : i64, scratch_operands = 1 : i64, tpu.core_type = #tpu.core_type<tc>, window_params = [{pipeline_mode = #tpu.pipeline_mode<synchronous>, transform_indices = @transform_0, window_bounds = array<i64: 9, 1, 256>}, {transform_indices = @transform_1, window_bounds = array<i64: 1, 4, 256>}, {pipeline_mode = #tpu.pipeline_mode<synchronous>, transform_indices = @transform_2, window_bounds = array<i64: 4, 36>}, {pipeline_mode = #tpu.pipeline_mode<synchronous>, transform_indices = @transform_3, window_bounds = array<i64: 4, 36>}, {pipeline_mode = #tpu.pipeline_mode<synchronous>, transform_indices = @transform_4, window_bounds = array<i64: 4, 1>}, {pipeline_mode = #tpu.pipeline_mode<synchronous>, transform_indices = @transform_5, window_bounds = array<i64: 4, 1>}, {pipeline_mode = #tpu.pipeline_mode<synchronous>, transform_indices = @transform_6, window_bounds = array<i64: 4, 1>}, {pipeline_mode = #tpu.pipeline_mode<synchronous>, transform_indices = @transform_7, window_bounds = array<i64: 4, 1>}, {transform_indices = @transform_8, window_bounds = array<i64: 1, 4, 256>}]} {
    %c0 = arith.constant 0 : index
    %c0_0 = arith.constant 0 : index
    %c0_1 = arith.constant 0 : index
    %0 = vector.load %arg2[%c0, %c0_0, %c0_1] : memref<1x4x256xf32, #tpu.memory_space<vmem>>, vector<1x4x256xf32>
    %1 = vector.shape_cast %0 : vector<1x4x256xf32> to vector<4x256xf32>
    %cst = arith.constant 0.000000e+00 : f32
    %2 = vector.broadcast %cst : f32 to vector<4x256xf32>
    %3 = arith.maximumf %1, %2 : vector<4x256xf32>
    %c0_2 = arith.constant 0 : index
    %c0_3 = arith.constant 0 : index
    %4 = vector.load %arg5[%c0_2, %c0_3] : memref<4x1xf32, #tpu.memory_space<vmem>>, vector<4x1xf32>
    %5 = vector.broadcast %4 : vector<4x1xf32> to vector<4x256xf32>
    %6 = arith.mulf %3, %5 : vector<4x256xf32>
    %c0_4 = arith.constant 0 : index
    %c0_5 = arith.constant 0 : index
    %7 = vector.load %arg6[%c0_4, %c0_5] : memref<4x1xf32, #tpu.memory_space<vmem>>, vector<4x1xf32>
    %8 = vector.broadcast %7 : vector<4x1xf32> to vector<4x256xf32>
    %9 = arith.addf %6, %8 : vector<4x256xf32>
    %c17_i32 = arith.constant 17 : i32
    %10 = tpu.dynamic_rotate %9 by %c17_i32 dim 1 : vector<4x256xf32>, i32 -> vector<4x256xf32>
    %c0_6 = arith.constant 0 : index
    %c0_7 = arith.constant 0 : index
    %c0_8 = arith.constant 0 : index
    %11 = vector.load %arg1[%c0_6, %c0_7, %c0_8] : memref<9x1x256xf32, #tpu.memory_space<vmem>>, vector<1x1x256xf32>
    %12 = vector.shape_cast %11 : vector<1x1x256xf32> to vector<1x256xf32>
    %13 = vector.broadcast %12 : vector<1x256xf32> to vector<4x256xf32>
    %14 = arith.mulf %10, %13 : vector<4x256xf32>
    %c0_9 = arith.constant 0 : index
    %c0_10 = arith.constant 0 : index
    %15 = vector.load %arg10[%c0_9, %c0_10] : memref<36x256xf32, #tpu.memory_space<vmem>>, vector<4x256xf32>
    tpu.vector_store %arg10[%c0_9, %c0_10], %14 {strides = array<i32>} : memref<36x256xf32, #tpu.memory_space<vmem>>, vector<4x256xf32>,
    %c16_i32 = arith.constant 16 : i32
    %16 = tpu.dynamic_rotate %9 by %c16_i32 dim 1 : vector<4x256xf32>, i32 -> vector<4x256xf32>
    %c1 = arith.constant 1 : index
    %c0_11 = arith.constant 0 : index
    %c0_12 = arith.constant 0 : index
    %17 = vector.load %arg1[%c1, %c0_11, %c0_12] : memref<9x1x256xf32, #tpu.memory_space<vmem>>, vector<1x1x256xf32>
    %18 = vector.shape_cast %17 : vector<1x1x256xf32> to vector<1x256xf32>
    %19 = vector.broadcast %18 : vector<1x256xf32> to vector<4x256xf32>
    %20 = arith.mulf %16, %19 : vector<4x256xf32>
    %c4 = arith.constant 4 : index
    %c0_13 = arith.constant 0 : index
    %21 = vector.load %arg10[%c4, %c0_13] : memref<36x256xf32, #tpu.memory_space<vmem>>, vector<4x256xf32>
    tpu.vector_store %arg10[%c4, %c0_13], %20 {strides = array<i32>} : memref<36x256xf32, #tpu.memory_space<vmem>>, vector<4x256xf32>,
    %c15_i32 = arith.constant 15 : i32
    %22 = tpu.dynamic_rotate %9 by %c15_i32 dim 1 : vector<4x256xf32>, i32 -> vector<4x256xf32>
    %c2 = arith.constant 2 : index
    %c0_14 = arith.constant 0 : index
    %c0_15 = arith.constant 0 : index
    %23 = vector.load %arg1[%c2, %c0_14, %c0_15] : memref<9x1x256xf32, #tpu.memory_space<vmem>>, vector<1x1x256xf32>
    %24 = vector.shape_cast %23 : vector<1x1x256xf32> to vector<1x256xf32>
    %25 = vector.broadcast %24 : vector<1x256xf32> to vector<4x256xf32>
    %26 = arith.mulf %22, %25 : vector<4x256xf32>
    %c8 = arith.constant 8 : index
    %c0_16 = arith.constant 0 : index
    %27 = vector.load %arg10[%c8, %c0_16] : memref<36x256xf32, #tpu.memory_space<vmem>>, vector<4x256xf32>
    tpu.vector_store %arg10[%c8, %c0_16], %26 {strides = array<i32>} : memref<36x256xf32, #tpu.memory_space<vmem>>, vector<4x256xf32>,
    %c1_i32 = arith.constant 1 : i32
    %28 = tpu.dynamic_rotate %9 by %c1_i32 dim 1 : vector<4x256xf32>, i32 -> vector<4x256xf32>
    %c3 = arith.constant 3 : index
    %c0_17 = arith.constant 0 : index
    %c0_18 = arith.constant 0 : index
    %29 = vector.load %arg1[%c3, %c0_17, %c0_18] : memref<9x1x256xf32, #tpu.memory_space<vmem>>, vector<1x1x256xf32>
    %30 = vector.shape_cast %29 : vector<1x1x256xf32> to vector<1x256xf32>
    %31 = vector.broadcast %30 : vector<1x256xf32> to vector<4x256xf32>
    %32 = arith.mulf %28, %31 : vector<4x256xf32>
    %c12 = arith.constant 12 : index
    %c0_19 = arith.constant 0 : index
    %33 = vector.load %arg10[%c12, %c0_19] : memref<36x256xf32, #tpu.memory_space<vmem>>, vector<4x256xf32>
    tpu.vector_store %arg10[%c12, %c0_19], %32 {strides = array<i32>} : memref<36x256xf32, #tpu.memory_space<vmem>>, vector<4x256xf32>,
    %c16 = arith.constant 16 : index
    %c0_20 = arith.constant 0 : index
    %34 = vector.load %arg10[%c16, %c0_20] : memref<36x256xf32, #tpu.memory_space<vmem>>, vector<4x256xf32>
    tpu.vector_store %arg10[%c16, %c0_20], %9 {strides = array<i32>} : memref<36x256xf32, #tpu.memory_space<vmem>>, vector<4x256xf32>,
    %c255_i32 = arith.constant 255 : i32
    %35 = tpu.dynamic_rotate %9 by %c255_i32 dim 1 : vector<4x256xf32>, i32 -> vector<4x256xf32>
    %c5 = arith.constant 5 : index
    %c0_21 = arith.constant 0 : index
    %c0_22 = arith.constant 0 : index
    %36 = vector.load %arg1[%c5, %c0_21, %c0_22] : memref<9x1x256xf32, #tpu.memory_space<vmem>>, vector<1x1x256xf32>
    %37 = vector.shape_cast %36 : vector<1x1x256xf32> to vector<1x256xf32>
    %38 = vector.broadcast %37 : vector<1x256xf32> to vector<4x256xf32>
    %39 = arith.mulf %35, %38 : vector<4x256xf32>
    %c20 = arith.constant 20 : index
    %c0_23 = arith.constant 0 : index
    %40 = vector.load %arg10[%c20, %c0_23] : memref<36x256xf32, #tpu.memory_space<vmem>>, vector<4x256xf32>
    tpu.vector_store %arg10[%c20, %c0_23], %39 {strides = array<i32>} : memref<36x256xf32, #tpu.memory_space<vmem>>, vector<4x256xf32>,
    %c241_i32 = arith.constant 241 : i32
    %41 = tpu.dynamic_rotate %9 by %c241_i32 dim 1 : vector<4x256xf32>, i32 -> vector<4x256xf32>
    %c6 = arith.constant 6 : index
    %c0_24 = arith.constant 0 : index
    %c0_25 = arith.constant 0 : index
    %42 = vector.load %arg1[%c6, %c0_24, %c0_25] : memref<9x1x256xf32, #tpu.memory_space<vmem>>, vector<1x1x256xf32>
    %43 = vector.shape_cast %42 : vector<1x1x256xf32> to vector<1x256xf32>
    %44 = vector.broadcast %43 : vector<1x256xf32> to vector<4x256xf32>
    %45 = arith.mulf %41, %44 : vector<4x256xf32>
    %c24 = arith.constant 24 : index
    %c0_26 = arith.constant 0 : index
    %46 = vector.load %arg10[%c24, %c0_26] : memref<36x256xf32, #tpu.memory_space<vmem>>, vector<4x256xf32>
    tpu.vector_store %arg10[%c24, %c0_26], %45 {strides = array<i32>} : memref<36x256xf32, #tpu.memory_space<vmem>>, vector<4x256xf32>,
    %c240_i32 = arith.constant 240 : i32
    %47 = tpu.dynamic_rotate %9 by %c240_i32 dim 1 : vector<4x256xf32>, i32 -> vector<4x256xf32>
    %c7 = arith.constant 7 : index
    %c0_27 = arith.constant 0 : index
    %c0_28 = arith.constant 0 : index
    %48 = vector.load %arg1[%c7, %c0_27, %c0_28] : memref<9x1x256xf32, #tpu.memory_space<vmem>>, vector<1x1x256xf32>
    %49 = vector.shape_cast %48 : vector<1x1x256xf32> to vector<1x256xf32>
    %50 = vector.broadcast %49 : vector<1x256xf32> to vector<4x256xf32>
    %51 = arith.mulf %47, %50 : vector<4x256xf32>
    %c28 = arith.constant 28 : index
    %c0_29 = arith.constant 0 : index
    %52 = vector.load %arg10[%c28, %c0_29] : memref<36x256xf32, #tpu.memory_space<vmem>>, vector<4x256xf32>
    tpu.vector_store %arg10[%c28, %c0_29], %51 {strides = array<i32>} : memref<36x256xf32, #tpu.memory_space<vmem>>, vector<4x256xf32>,
    %c239_i32 = arith.constant 239 : i32
    %53 = tpu.dynamic_rotate %9 by %c239_i32 dim 1 : vector<4x256xf32>, i32 -> vector<4x256xf32>
    %c8_30 = arith.constant 8 : index
    %c0_31 = arith.constant 0 : index
    %c0_32 = arith.constant 0 : index
    %54 = vector.load %arg1[%c8_30, %c0_31, %c0_32] : memref<9x1x256xf32, #tpu.memory_space<vmem>>, vector<1x1x256xf32>
    %55 = vector.shape_cast %54 : vector<1x1x256xf32> to vector<1x256xf32>
    %56 = vector.broadcast %55 : vector<1x256xf32> to vector<4x256xf32>
    %57 = arith.mulf %53, %56 : vector<4x256xf32>
    %c32 = arith.constant 32 : index
    %c0_33 = arith.constant 0 : index
    %58 = vector.load %arg10[%c32, %c0_33] : memref<36x256xf32, #tpu.memory_space<vmem>>, vector<4x256xf32>
    tpu.vector_store %arg10[%c32, %c0_33], %57 {strides = array<i32>} : memref<36x256xf32, #tpu.memory_space<vmem>>, vector<4x256xf32>,
    %c0_34 = arith.constant 0 : index
    %c0_35 = arith.constant 0 : index
    %59 = vector.load %arg3[%c0_34, %c0_35] : memref<4x36xbf16, #tpu.memory_space<vmem>>, vector<4x36xbf16>
    %c0_36 = arith.constant 0 : index
    %c0_37 = arith.constant 0 : index
    %60 = vector.load %arg10[%c0_36, %c0_37] : memref<36x256xf32, #tpu.memory_space<vmem>>, vector<36x256xf32>
    %61 = arith.truncf %60 : vector<36x256xf32> to vector<36x256xbf16>
    %cst_38 = arith.constant dense<0.000000e+00> : vector<4x256xf32>
    %62 = tpu.matmul %59, %61, %cst_38 {dimension_numbers = #tpu.dot_dimension_numbers<[1], [0], [0], [1], [0, 0, 1, 1], [], []>} : vector<4x36xbf16>, vector<36x256xbf16>, vector<4x256xf32> -> vector<4x256xf32>
    %cst_39 = arith.constant 0.000000e+00 : f32
    %63 = vector.broadcast %cst_39 : f32 to vector<4x256xf32>
    %64 = arith.maximumf %62, %63 : vector<4x256xf32>
    %c0_40 = arith.constant 0 : index
    %c0_41 = arith.constant 0 : index
    %65 = vector.load %arg7[%c0_40, %c0_41] : memref<4x1xf32, #tpu.memory_space<vmem>>, vector<4x1xf32>
    %66 = vector.broadcast %65 : vector<4x1xf32> to vector<4x256xf32>
    %67 = arith.mulf %64, %66 : vector<4x256xf32>
    %c0_42 = arith.constant 0 : index
    %c0_43 = arith.constant 0 : index
    %68 = vector.load %arg8[%c0_42, %c0_43] : memref<4x1xf32, #tpu.memory_space<vmem>>, vector<4x1xf32>
    %69 = vector.broadcast %68 : vector<4x1xf32> to vector<4x256xf32>
    %70 = arith.addf %67, %69 : vector<4x256xf32>
    %c17_i32_44 = arith.constant 17 : i32
    %71 = tpu.dynamic_rotate %70 by %c17_i32_44 dim 1 : vector<4x256xf32>, i32 -> vector<4x256xf32>
    %c0_45 = arith.constant 0 : index
    %c0_46 = arith.constant 0 : index
    %c0_47 = arith.constant 0 : index
    %72 = vector.load %arg1[%c0_45, %c0_46, %c0_47] : memref<9x1x256xf32, #tpu.memory_space<vmem>>, vector<1x1x256xf32>
    %73 = vector.shape_cast %72 : vector<1x1x256xf32> to vector<1x256xf32>
    %74 = vector.broadcast %73 : vector<1x256xf32> to vector<4x256xf32>
    %75 = arith.mulf %71, %74 : vector<4x256xf32>
    %c0_48 = arith.constant 0 : index
    %c0_49 = arith.constant 0 : index
    %76 = vector.load %arg10[%c0_48, %c0_49] : memref<36x256xf32, #tpu.memory_space<vmem>>, vector<4x256xf32>
    tpu.vector_store %arg10[%c0_48, %c0_49], %75 {strides = array<i32>} : memref<36x256xf32, #tpu.memory_space<vmem>>, vector<4x256xf32>,
    %c16_i32_50 = arith.constant 16 : i32
    %77 = tpu.dynamic_rotate %70 by %c16_i32_50 dim 1 : vector<4x256xf32>, i32 -> vector<4x256xf32>
    %c1_51 = arith.constant 1 : index
    %c0_52 = arith.constant 0 : index
    %c0_53 = arith.constant 0 : index
    %78 = vector.load %arg1[%c1_51, %c0_52, %c0_53] : memref<9x1x256xf32, #tpu.memory_space<vmem>>, vector<1x1x256xf32>
    %79 = vector.shape_cast %78 : vector<1x1x256xf32> to vector<1x256xf32>
    %80 = vector.broadcast %79 : vector<1x256xf32> to vector<4x256xf32>
    %81 = arith.mulf %77, %80 : vector<4x256xf32>
    %c4_54 = arith.constant 4 : index
    %c0_55 = arith.constant 0 : index
    %82 = vector.load %arg10[%c4_54, %c0_55] : memref<36x256xf32, #tpu.memory_space<vmem>>, vector<4x256xf32>
    tpu.vector_store %arg10[%c4_54, %c0_55], %81 {strides = array<i32>} : memref<36x256xf32, #tpu.memory_space<vmem>>, vector<4x256xf32>,
    %c15_i32_56 = arith.constant 15 : i32
    %83 = tpu.dynamic_rotate %70 by %c15_i32_56 dim 1 : vector<4x256xf32>, i32 -> vector<4x256xf32>
    %c2_57 = arith.constant 2 : index
    %c0_58 = arith.constant 0 : index
    %c0_59 = arith.constant 0 : index
    %84 = vector.load %arg1[%c2_57, %c0_58, %c0_59] : memref<9x1x256xf32, #tpu.memory_space<vmem>>, vector<1x1x256xf32>
    %85 = vector.shape_cast %84 : vector<1x1x256xf32> to vector<1x256xf32>
    %86 = vector.broadcast %85 : vector<1x256xf32> to vector<4x256xf32>
    %87 = arith.mulf %83, %86 : vector<4x256xf32>
    %c8_60 = arith.constant 8 : index
    %c0_61 = arith.constant 0 : index
    %88 = vector.load %arg10[%c8_60, %c0_61] : memref<36x256xf32, #tpu.memory_space<vmem>>, vector<4x256xf32>
    tpu.vector_store %arg10[%c8_60, %c0_61], %87 {strides = array<i32>} : memref<36x256xf32, #tpu.memory_space<vmem>>, vector<4x256xf32>,
    %c1_i32_62 = arith.constant 1 : i32
    %89 = tpu.dynamic_rotate %70 by %c1_i32_62 dim 1 : vector<4x256xf32>, i32 -> vector<4x256xf32>
    %c3_63 = arith.constant 3 : index
    %c0_64 = arith.constant 0 : index
    %c0_65 = arith.constant 0 : index
    %90 = vector.load %arg1[%c3_63, %c0_64, %c0_65] : memref<9x1x256xf32, #tpu.memory_space<vmem>>, vector<1x1x256xf32>
    %91 = vector.shape_cast %90 : vector<1x1x256xf32> to vector<1x256xf32>
    %92 = vector.broadcast %91 : vector<1x256xf32> to vector<4x256xf32>
    %93 = arith.mulf %89, %92 : vector<4x256xf32>
    %c12_66 = arith.constant 12 : index
    %c0_67 = arith.constant 0 : index
    %94 = vector.load %arg10[%c12_66, %c0_67] : memref<36x256xf32, #tpu.memory_space<vmem>>, vector<4x256xf32>
    tpu.vector_store %arg10[%c12_66, %c0_67], %93 {strides = array<i32>} : memref<36x256xf32, #tpu.memory_space<vmem>>, vector<4x256xf32>,
    %c16_68 = arith.constant 16 : index
    %c0_69 = arith.constant 0 : index
    %95 = vector.load %arg10[%c16_68, %c0_69] : memref<36x256xf32, #tpu.memory_space<vmem>>, vector<4x256xf32>
    tpu.vector_store %arg10[%c16_68, %c0_69], %70 {strides = array<i32>} : memref<36x256xf32, #tpu.memory_space<vmem>>, vector<4x256xf32>,
    %c255_i32_70 = arith.constant 255 : i32
    %96 = tpu.dynamic_rotate %70 by %c255_i32_70 dim 1 : vector<4x256xf32>, i32 -> vector<4x256xf32>
    %c5_71 = arith.constant 5 : index
    %c0_72 = arith.constant 0 : index
    %c0_73 = arith.constant 0 : index
    %97 = vector.load %arg1[%c5_71, %c0_72, %c0_73] : memref<9x1x256xf32, #tpu.memory_space<vmem>>, vector<1x1x256xf32>
    %98 = vector.shape_cast %97 : vector<1x1x256xf32> to vector<1x256xf32>
    %99 = vector.broadcast %98 : vector<1x256xf32> to vector<4x256xf32>
    %100 = arith.mulf %96, %99 : vector<4x256xf32>
    %c20_74 = arith.constant 20 : index
    %c0_75 = arith.constant 0 : index
    %101 = vector.load %arg10[%c20_74, %c0_75] : memref<36x256xf32, #tpu.memory_space<vmem>>, vector<4x256xf32>
    tpu.vector_store %arg10[%c20_74, %c0_75], %100 {strides = array<i32>} : memref<36x256xf32, #tpu.memory_space<vmem>>, vector<4x256xf32>,
    %c241_i32_76 = arith.constant 241 : i32
    %102 = tpu.dynamic_rotate %70 by %c241_i32_76 dim 1 : vector<4x256xf32>, i32 -> vector<4x256xf32>
    %c6_77 = arith.constant 6 : index
    %c0_78 = arith.constant 0 : index
    %c0_79 = arith.constant 0 : index
    %103 = vector.load %arg1[%c6_77, %c0_78, %c0_79] : memref<9x1x256xf32, #tpu.memory_space<vmem>>, vector<1x1x256xf32>
    %104 = vector.shape_cast %103 : vector<1x1x256xf32> to vector<1x256xf32>
    %105 = vector.broadcast %104 : vector<1x256xf32> to vector<4x256xf32>
    %106 = arith.mulf %102, %105 : vector<4x256xf32>
    %c24_80 = arith.constant 24 : index
    %c0_81 = arith.constant 0 : index
    %107 = vector.load %arg10[%c24_80, %c0_81] : memref<36x256xf32, #tpu.memory_space<vmem>>, vector<4x256xf32>
    tpu.vector_store %arg10[%c24_80, %c0_81], %106 {strides = array<i32>} : memref<36x256xf32, #tpu.memory_space<vmem>>, vector<4x256xf32>,
    %c240_i32_82 = arith.constant 240 : i32
    %108 = tpu.dynamic_rotate %70 by %c240_i32_82 dim 1 : vector<4x256xf32>, i32 -> vector<4x256xf32>
    %c7_83 = arith.constant 7 : index
    %c0_84 = arith.constant 0 : index
    %c0_85 = arith.constant 0 : index
    %109 = vector.load %arg1[%c7_83, %c0_84, %c0_85] : memref<9x1x256xf32, #tpu.memory_space<vmem>>, vector<1x1x256xf32>
    %110 = vector.shape_cast %109 : vector<1x1x256xf32> to vector<1x256xf32>
    %111 = vector.broadcast %110 : vector<1x256xf32> to vector<4x256xf32>
    %112 = arith.mulf %108, %111 : vector<4x256xf32>
    %c28_86 = arith.constant 28 : index
    %c0_87 = arith.constant 0 : index
    %113 = vector.load %arg10[%c28_86, %c0_87] : memref<36x256xf32, #tpu.memory_space<vmem>>, vector<4x256xf32>
    tpu.vector_store %arg10[%c28_86, %c0_87], %112 {strides = array<i32>} : memref<36x256xf32, #tpu.memory_space<vmem>>, vector<4x256xf32>,
    %c239_i32_88 = arith.constant 239 : i32
    %114 = tpu.dynamic_rotate %70 by %c239_i32_88 dim 1 : vector<4x256xf32>, i32 -> vector<4x256xf32>
    %c8_89 = arith.constant 8 : index
    %c0_90 = arith.constant 0 : index
    %c0_91 = arith.constant 0 : index
    %115 = vector.load %arg1[%c8_89, %c0_90, %c0_91] : memref<9x1x256xf32, #tpu.memory_space<vmem>>, vector<1x1x256xf32>
    %116 = vector.shape_cast %115 : vector<1x1x256xf32> to vector<1x256xf32>
    %117 = vector.broadcast %116 : vector<1x256xf32> to vector<4x256xf32>
    %118 = arith.mulf %114, %117 : vector<4x256xf32>
    %c32_92 = arith.constant 32 : index
    %c0_93 = arith.constant 0 : index
    %119 = vector.load %arg10[%c32_92, %c0_93] : memref<36x256xf32, #tpu.memory_space<vmem>>, vector<4x256xf32>
    tpu.vector_store %arg10[%c32_92, %c0_93], %118 {strides = array<i32>} : memref<36x256xf32, #tpu.memory_space<vmem>>, vector<4x256xf32>,
    %c0_94 = arith.constant 0 : index
    %c0_95 = arith.constant 0 : index
    %120 = vector.load %arg4[%c0_94, %c0_95] : memref<4x36xbf16, #tpu.memory_space<vmem>>, vector<4x36xbf16>
    %c0_96 = arith.constant 0 : index
    %c0_97 = arith.constant 0 : index
    %121 = vector.load %arg10[%c0_96, %c0_97] : memref<36x256xf32, #tpu.memory_space<vmem>>, vector<36x256xf32>
    %122 = arith.truncf %121 : vector<36x256xf32> to vector<36x256xbf16>
    %cst_98 = arith.constant dense<0.000000e+00> : vector<4x256xf32>
    %123 = tpu.matmul %120, %122, %cst_98 {dimension_numbers = #tpu.dot_dimension_numbers<[1], [0], [0], [1], [0, 0, 1, 1], [], []>} : vector<4x36xbf16>, vector<36x256xbf16>, vector<4x256xf32> -> vector<4x256xf32>
    %c0_99 = arith.constant 0 : index
    %c0_100 = arith.constant 0 : index
    %c0_101 = arith.constant 0 : index
    %124 = vector.load %arg2[%c0_99, %c0_100, %c0_101] : memref<1x4x256xf32, #tpu.memory_space<vmem>>, vector<1x4x256xf32>
    %125 = vector.shape_cast %124 : vector<1x4x256xf32> to vector<4x256xf32>
    %126 = arith.addf %123, %125 : vector<4x256xf32>
    %c0_102 = arith.constant 0 : index
    %c0_103 = arith.constant 0 : index
    %c0_104 = arith.constant 0 : index
    %127 = vector.load %arg9[%c0_102, %c0_103, %c0_104] : memref<1x4x256xf32, #tpu.memory_space<vmem>>, vector<1x4x256xf32>
    %128 = vector.shape_cast %127 : vector<1x4x256xf32> to vector<4x256xf32>
    %129 = vector.shape_cast %126 : vector<4x256xf32> to vector<1x4x256xf32>
    tpu.vector_store %arg9[%c0_102, %c0_103, %c0_104], %129 {strides = array<i32>} : memref<1x4x256xf32, #tpu.memory_space<vmem>>, vector<1x4x256xf32>,
    return
  }
  func.func @transform_0(%arg0: i32) -> (i32, i32, i32) {
    %c0_i32 = arith.constant 0 : i32
    %c0_i32_0 = arith.constant 0 : i32
    %c0_i32_1 = arith.constant 0 : i32
    %c0_i32_2 = arith.constant 0 : i32
    return %c0_i32, %c0_i32_0, %c0_i32_1 : i32, i32, i32
  }
  func.func @transform_1(%arg0: i32) -> (i32, i32, i32) {
    %c0_i32 = arith.constant 0 : i32
    %c0_i32_0 = arith.constant 0 : i32
    %c0_i32_1 = arith.constant 0 : i32
    return %arg0, %c0_i32, %c0_i32_0 : i32, i32, i32
  }
  func.func @transform_2(%arg0: i32) -> (i32, i32) {
    %c0_i32 = arith.constant 0 : i32
    %c0_i32_0 = arith.constant 0 : i32
    %c0_i32_1 = arith.constant 0 : i32
    return %c0_i32, %c0_i32_0 : i32, i32
  }
  func.func @transform_3(%arg0: i32) -> (i32, i32) {
    %c0_i32 = arith.constant 0 : i32
    %c0_i32_0 = arith.constant 0 : i32
    %c0_i32_1 = arith.constant 0 : i32
    return %c0_i32, %c0_i32_0 : i32, i32
  }
  func.func @transform_4(%arg0: i32) -> (i32, i32) {
    %c0_i32 = arith.constant 0 : i32
    %c0_i32_0 = arith.constant 0 : i32
    %c0_i32_1 = arith.constant 0 : i32
    return %c0_i32, %c0_i32_0 : i32, i32
  }
  func.func @transform_5(%arg0: i32) -> (i32, i32) {
    %c0_i32 = arith.constant 0 : i32
    %c0_i32_0 = arith.constant 0 : i32
    %c0_i32_1 = arith.constant 0 : i32
    return %c0_i32, %c0_i32_0 : i32, i32
  }
  func.func @transform_6(%arg0: i32) -> (i32, i32) {
    %c0_i32 = arith.constant 0 : i32
    %c0_i32_0 = arith.constant 0 : i32
    %c0_i32_1 = arith.constant 0 : i32
    return %c0_i32, %c0_i32_0 : i32, i32
  }
  func.func @transform_7(%arg0: i32) -> (i32, i32) {
    %c0_i32 = arith.constant 0 : i32
    %c0_i32_0 = arith.constant 0 : i32
    %c0_i32_1 = arith.constant 0 : i32
    return %c0_i32, %c0_i32_0 : i32, i32
  }
  func.func @transform_8(%arg0: i32) -> (i32, i32, i32) {
    %c0_i32 = arith.constant 0 : i32
    %c0_i32_0 = arith.constant 0 : i32
    %c0_i32_1 = arith.constant 0 : i32
    return %arg0, %c0_i32, %c0_i32_0 : i32, i32, i32
  }
}

</mosaic_0001>

<bundles_post_ra>
// kernel: tpu_custom_call.1
= control target key start
LH: loop header
LB: loop body
LE: loop exit
PB: predicated region body
PF: predicated region fallthrough
CT: control target
= control target key end

     0   :  { %13 = vsyncpa [#allocation4], 0  ;;  %s1658_s0 = inlined_call_operand.vmem [shape: f32[9,1,256], index: 0, kind: input, shape index: {}]   ;;  %s1659_s1 = inlined_call_operand.hbm [shape: f32[2,4,256], index: 1, kind: input, shape index: {}]   ;;  %s1660_s2 = inlined_call_operand.vmem [shape: bf16[4,36], index: 2, kind: input, shape index: {}]   ;;  %s1661_s3 = inlined_call_operand.vmem [shape: bf16[4,36], index: 3, kind: input, shape index: {}]   ;;  %s1662_s4 = inlined_call_operand.vmem [shape: f32[4,1], index: 4, kind: input, shape index: {}]   ;;  %s1663_s5 = inlined_call_operand.vmem [shape: f32[4,1], index: 5, kind: input, shape index: {}]   ;;  %s1664_s6 = inlined_call_operand.vmem [shape: f32[4,1], index: 6, kind: input, shape index: {}]   ;;  %s1665_s7 = inlined_call_operand.vmem [shape: f32[4,1], index: 7, kind: input, shape index: {}]   ;;  %s1666_s8 = inlined_call_operand.hbm [shape: f32[2,4,256], index: 8, kind: output, shape index: {}]  }
   0x1   :  { %15 = vsyncpa [#allocation4 + $0x1], 0 }
   0x2   :  { %16 = vsyncpa [#allocation5], 0 }
   0x3   :  { %18 = vsyncpa [#allocation5 + $0x1], 0  ;;  %s1273_s27 = smov 0   ;;  %s1275_s28 = smov 0  }
   0x4   :  { %s1277_s29 = smov 0   ;;  %s1279_s30 = smov 0  }
   0x5 LB: > { %s1294_s9 = sadd.s32 4294967295, %s1214_s30   ;;  %s1025_s10 = sadd.s32 4294967294, %s1214_s30   ;;  %s1214_s30 = sphi %s1279_s30, %s1689_s30   ;;  %s1210_s29 = sphi %s1277_s29, %s1688_s29   ;;  %s1206_s28 = sphi %s1275_s28, %s1687_s28   ;;  %s1202_s27 = sphi %s1273_s27, %s1686_s27  }
   0x6   : > { %s1298_s11 = sadd.s32 1, %s1214_s30   ;;  %s52_s12 = sadd.s32 1, %s1210_s29 }
   0x7   : > { %s49_s13 = ssub.s32 %s1214_s30, %s1298_s11  ;;  %p59_p0 = scmp.ne.s32.totalorder %s1210_s29, %s1206_s28 }
   0x8   : > { %p50_p1 = scmp.eq.s32.totalorder %s49_s13, 0  ;;  %p60_p2 = scmp.eq.s32.totalorder %s1214_s30, 0 }
   0x9   : > { %p65_p3 = scmp.ne.s32.totalorder %s1206_s28, %s1202_s27  ;;  %p66_p4 = scmp.eq.s32.totalorder %s1294_s9, 0 }
   0xa   : > { %s1310_s14 = scalar_select %p50_p1, %s1210_s29, %s52_s12  }
   0xb   : > { %p1312_p5 = por %p60_p2, %p59_p0  ;;  %p1316_p6 = por %p66_p4, %p65_p3 }
   0xc   : > { %p215_p7 = scmp.eq.s32.totalorder %s1294_s9, 1  ;;  %p221_p8 = scmp.eq.s32.totalorder %s1025_s10, 1 }
   0xd   : > { %p1071_p10 = scmp.lt.s32.totalorder %s1214_s30, 2  ;;  %s262_s19 = sand.u32 1, %s1210_s29  }
   0xe   : > { %p1323_p11 = por %p215_p7, %p59_p0  ;;  %p1327_p12 = por %p221_p8, %p65_p3 }
   0xf   : > { %s1057_s20 = sshll.u32 %s1214_s30, 7  ;;  %s1028_s21 = sshll.u32 %s262_s19, 3 }
  0x10   : > { %s1675_s17 = scalar_select %p1323_p11, 1, 0 }
  0x11   : > { %s1676_s18 = scalar_select %p1327_p12, 1, 0 }
  0x12   : > { %s1336_s24 = scalar_lea.hbm %s1659_s1, %s1057_s20  ;;  %s266_s25 = scalar_lea.vmem [#allocation3], %s1028_s21 }
  0x13   : > { %s274_s26 = sshll.u32 %s266_s25, 4  ;;  %p1340_p13 = pnand %p1071_p10, %p1312_p5  ;;  %s1344_s26 = int_to_ptr.vmem [resolvable:$true] %s274_s26 }
  0x14   : > { %s263_s12 = scalar_lea.sflag [#allocation4], %s262_s19  ;;  %s1118_s13 = scalar_lea.hbm %s1336_s24, 128 }
  0x15   : > { %p1119_p2 = scmp.ne.s32.totalorder %s1336_s24, %s1118_s13  ;;  %p1120_p3 = pneg %p1340_p13 }
  0x16   : > { %s1123_s21 = scalar_lea.hbm %s1659_s1, 256  ;;  %p1124_p5 = scmp.lt.u32.totalorder %s1336_s24, %s1659_s1 }
  0x17   : > { %p1121_p4 = pnand %p1120_p3, %p1119_p2  ;;  %p1125_p8 = scmp.lt.u32.totalorder %s1123_s21, %s1118_s13 }
  0x18   : > { %p1127_p9 = scmp.lt.u32.totalorder %s1118_s13, %s1336_s24 }
  0x19   : > { %p1122_p7 = pneg %p1121_p4  ;;  %p1126_p10 = por %p1125_p8, %p1124_p5 }
  0x1b   : > { %p1128_p0 = por %p1127_p9, %p1126_p10 }
  0x1d   : > { %p1129_p1 = pnand %p1128_p0, %p1122_p7 }
  0x1f   : > { %1132 = shalt.err (!%p1129_p1)
}
  0x20   : > { %s1133_s19 = scalar_lea.vmem %s1344_s26, 128  ;;  %s1216_s25 = smov [#allocation3]  }
  0x21   : > { %p1134_p2 = scmp.ne.s32.totalorder %s1344_s26, %s1133_s19  ;;  %s1138_s15 = sshll.u32 %s1216_s25, 4  ;;  %s1139_s15 = int_to_ptr.vmem [resolvable:$false] %s1138_s15 }
  0x22   : > { %s1140_s20 = scalar_lea.vmem %s1139_s15, 256  ;;  %p1141_p11 = scmp.lt.s32.totalorder %s1344_s26, %s1139_s15 }
  0x23   : > { %p1136_p4 = pnand %p1134_p2, %p1120_p3  ;;  %p1142_p5 = scmp.lt.s32.totalorder %s1140_s20, %s1133_s19 }
  0x25   : > { %p1137_p12 = pneg %p1136_p4  ;;  %p1143_p8 = por %p1142_p5, %p1141_p11 }
  0x27   : > { %p1144_p9 = pnand %p1143_p8, %p1137_p12 }
  0x29   : > { %1147 = shalt.err (!%p1144_p9)
}
  0x2a   : > { %1066 = dma.hbm_to_vmem [thread:$0]  (!%p1340_p13), %s1336_s24, 128, %s1344_s26, %s263_s12  }
  0x2b   : > { %p1678_p0 = scmp.lt.s32.totalorder %s1214_s30, 3  ;;  %p1679_p1 = scmp.ge.s32.totalorder %s1214_s30, 1 }
  0x2d   : > { %p280_p3 = pnand %p1679_p1, %p1678_p0 }
  0x2e   : > { %s1378_s13 = sand.u32 (!%p280_p3), 1, %s1206_s28  }
  0x2f   : > { %283 = sbr.rel (%p280_p3) target bundleno = 968 (0x3c8), region = 52  ;;  %s1668_s21 = sshll.u32 (!%p280_p3), %s1378_s13, 3 }
  0x30   : > { %s286_s22 = scalar_lea.sflag (!%p280_p3), [#allocation4], %s1378_s13  ;;  %s289_s10 = scalar_lea.vmem (!%p280_p3), [#allocation3], %s1668_s21 }
  0x36   : > { %1193 = dma.done.wait (%p1316_p6), %s286_s22, 128  }
  0x37   : > { %1195 = vsyncadd (%p1316_p6), %s286_s22, 4294967168  ;;  %v1217_v0 = vmov 0   ;;  %v325_v1 = vld [vmem:[%s1662_s4] sm:$0xf]  ;;  %v1218_v3 = vmov 839922192   ;;  %v333_v5 = vlaneseq }
  0x38   : > { %1115 = vset.pattern.permute.xlu0 %v1217_v0  ;;  %635 = vmatprep.mubr.bf16.mxu0 %v1217_v0  ;;  %v339_v2 = vld [vmem:[%s1663_s5] sm:$0xf]  ;;  %v331_v4 = vunpack.c.l.s4 %v1218_v3  ;;  %v1394_v9 = vld [vmem:[%s289_s10] sm:$0xff]  ;;  %s1219_s16 = smov 1   ;;  %s1220_s19 = smov 16   ;;  %vm596_vm8 = vcmask 1041408  }
  0x39   : > { %1116 = vset.pattern.permute.xlu1 %v1217_v0  ;;  %926 = vmatprep.mubr.bf16.mxu1 %v1217_v0  ;;  %v334_v7 = vshrl.u32 %v333_v5, 7  ;;  %v324_v11 = vmax.f32 %v1394_v9, 0.0  ;;  %s1221_s25 = smov 17   ;;  %s1222_s15 = smov 15   ;;  %v646_v18 = vld [vmem:[%s1664_s6] sm:$0xf] }
  0x3a   : > { %328 = vperm.xlu0 %1115, %v325_v1   ;;  %v332_v6 = vunpack.c.0.s8 %v331_v4  ;;  %s1671_s20 = smov 127   ;;  %s1669_s22 = smov 112   ;;  %v654_v19 = vld [vmem:[%s1665_s7] sm:$0xf]  ;;  %v1419_v20 = vand.u32 127, %v333_v5  ;;  %vm592_vm9 = vcmask 293888  }
  0x3b   : > { %s1225_s10 = smov 113   ;;  %s1226_s24 = smov 111   ;;  %v1421_v21 = vsub.s32 0, %v334_v7  ;;  %v1423_v22 = vsub.s32 1, %v334_v7  ;;  %v1034_v23 = vld [vmem:[%s1658_s0 + $0x2] sm:$0x3] }
  0x3c   : > { %v335_v8 = vsub.s32 %v332_v6, %v334_v7  ;;  %vm385_vm0 = vcmp.lt.s32.totalorder %v1419_v20, 16  ;;  %v1036_v28 = vld [vmem:[%s1658_s0 + $0x6] sm:$0x3]  ;;  %vm439_vm1 = vcmp.lt.s32.totalorder %v1419_v20, 1  ;;  %v365_v37 = vld [vmem:[%s1658_s0] sm:$0x3] }
  0x3d   : > { %v394_v26 = vrot.slane %v1034_v23, %v1421_v21  ;;  %v398_v27 = vrot.slane %v1034_v23, %v1423_v22  ;;  %v448_v35 = vrot.slane %v1036_v28, %v1421_v21  ;;  %v452_v36 = vrot.slane %v1036_v28, %v1423_v22  ;;  %v1035_v48 = vld [vmem:[%s1658_s0 + $0x4] sm:$0x3]  ;;  %v1037_v59 = vld [vmem:[%s1658_s0 + $0xa] sm:$0x3]  ;;  %v1039_v3 = vld [vmem:[%s1658_s0 + $0xe] sm:$0x3] }
  0x3e   : > { %342 = vperm.xlu0 %1115, %v339_v2   ;;  %vm362_vm2 = vcmp.lt.s32.totalorder %v1419_v20, 17  ;;  %v370_v46 = vrot.slane %v365_v37, %v1421_v21  ;;  %v374_v47 = vrot.slane %v365_v37, %v1423_v22  ;;  %vm415_vm3 = vcmp.lt.s32.totalorder %v1419_v20, 15  ;;  %v1040_v28 = vld [vmem:[%s1658_s0 + $0x10] sm:$0x3]  ;;  %s1680_s12 = smov 127   ;;  %s1681_s23 = smov 112  }
  0x3f   : > { %v424_v57 = vrot.slane %v1035_v48, %v1421_v21  ;;  %v428_v58 = vrot.slane %v1035_v48, %v1423_v22  ;;  %vm471_vm4 = vcmp.lt.s32.totalorder %v1419_v20, 127  ;;  %v480_v1 = vrot.slane %v1037_v59, %v1421_v21  ;;  %s1058_s21 = sshll.u32 %s1294_s9, 7  ;;  %s1682_s26 = sshll.u32 %s1378_s13, 3 }
  0x40   : > { %v484_v2 = vrot.slane %v1037_v59, %v1423_v22  ;;  %vm525_vm5 = vcmp.lt.s32.totalorder %v1419_v20, 112  ;;  %vm501_vm6 = vcmp.lt.s32.totalorder %v1419_v20, 113  ;;  %vm555_vm7 = vcmp.lt.s32.totalorder %v1419_v20, 111  ;;  %p1683_p11 = scmp.ne.s32.totalorder %s1675_s17, 0 }
  0xb9   : > { %v329_v10 = vpop.permute.xlu0 %328 }
  0xba   : > { %v336_v12 = vrot.slane %v329_v10, %v335_v8 }
  0xbc   : > { %v338_v14 = vmul.f32 %v336_v12, %v324_v11  ;;  %v534_v11 = vrot.slane %v1039_v3, %v1421_v21  ;;  %v538_v12 = vrot.slane %v1039_v3, %v1423_v22 }
  0xbd   : > { %v343_v13 = vpop.permute.xlu0 %342 }
  0xbe   : > { %v350_v15 = vrot.slane %v343_v13, %v335_v8  ;;  %v1038_v13 = vld [vmem:[%s1658_s0 + $0xc] sm:$0x3] }
  0xc0   : > { %v352_v16 = vadd.f32 %v350_v15, %v338_v14 }
  0xc2   : > { %465 = vst [vmem:[#allocation2 + $0x20] sm:$0xf] %v352_v16  ;;  %435 = vrot.lane.b32.xlu0 %v352_v16, %s1219_s16  ;;  %381 = vrot.lane.b32.xlu1 %v352_v16, %s1220_s19  ;;  %v354_v17 = vcombine.high %v352_v16, %v352_v16 }
  0xc4   : > { %466 = vst [vmem:[#allocation2 + $0x28] sm:$0xf] %v354_v17 }
  0xc6   : > { %356 = vrot.lane.b32.xlu0 %v352_v16, %s1221_s25  ;;  %383 = vrot.lane.b32.xlu1 %v354_v17, %s1220_s19 }
  0xca   : > { %411 = vrot.lane.b32.xlu0 %v352_v16, %s1222_s15  ;;  %437 = vrot.lane.b32.xlu1 %v354_v17, %s1219_s16 }
  0xce   : > { %467 = vrot.lane.b32.xlu0 %v352_v16, %s1671_s20  ;;  %358 = vrot.lane.b32.xlu1 %v354_v17, %s1221_s25 }
  0xd2   : > { %521 = vrot.lane.b32.xlu0 %v352_v16, %s1669_s22  ;;  %413 = vrot.lane.b32.xlu1 %v354_v17, %s1222_s15 }
  0xd6   : > { %497 = vrot.lane.b32.xlu0 %v352_v16, %s1225_s10  ;;  %469 = vrot.lane.b32.xlu1 %v354_v17, %s1671_s20  ;;  %s321_s20 = scalar_lea.vmem [#allocation6], %s1682_s26 }
  0xda   : > { %551 = vrot.lane.b32.xlu0 %v352_v16, %s1226_s24  ;;  %523 = vrot.lane.b32.xlu1 %v354_v17, %s1669_s22  ;;  %s955_s22 = sshll.u32 %s321_s20, 4  ;;  %s1616_s22 = int_to_ptr.vmem [resolvable:$true] %s955_s22 }
  0xdb   : > { %s1148_s9 = scalar_lea.vmem %s1616_s22, 128 }
  0xdc   : > { %p1149_p6 = scmp.ne.s32.totalorder %s1616_s22, %s1148_s9 }
  0xde   : > { %649 = vperm.xlu0 %1115, %v646_v18   ;;  %499 = vrot.lane.b32.xlu1 %v354_v17, %s1225_s10  ;;  %p1150_p12 = pnand %p1149_p6, %p1683_p11 }
  0xe0   : > { %p1151_p13 = pneg %p1150_p12 }
  0xe2   : > { %553 = vrot.lane.b32.xlu1 %v354_v17, %s1226_s24 }
  0xe6   : > { %657 = vperm.xlu1 %1116, %v654_v19  }
 0x134   : > { %v436_v24 = vpop.permute.xlu0 %435  ;;  %v382_v25 = vpop.permute.xlu1 %381 }
 0x138   : > { %v357_v29 = vpop.permute.xlu0 %356  ;;  %v384_v30 = vpop.permute.xlu1 %383 }
 0x139   : > { %v386_v31 = vsel %vm385_vm0, %v382_v25, %v384_v30  ;;  %v387_v32 = vsel %vm385_vm0, %v384_v30, %v382_v25  ;;  %v510_v25 = vrot.slane %v1038_v13, %v1421_v21 }
 0x13a   : > { %v401_v33 = vmul.f32 %v394_v26, %v387_v32  ;;  %v402_v34 = vmul.f32 %v398_v27, %v386_v31  ;;  %v514_v26 = vrot.slane %v1038_v13, %v1423_v22 }
 0x13c   : > { %v405_v38 = vrot.slane %v401_v33, 4  ;;  %v406_v39 = vrot.slane %v402_v34, 4  ;;  %v412_v40 = vpop.permute.xlu0 %411  ;;  %v438_v41 = vpop.permute.xlu1 %437 }
 0x13d   : > { %v440_v42 = vsel %vm439_vm1, %v436_v24, %v438_v41  ;;  %v441_v43 = vsel %vm439_vm1, %v438_v41, %v436_v24  ;;  %v564_v41 = vrot.slane %v1040_v28, %v1421_v21 }
 0x13e   : > { %409 = vst [vmem:[#allocation2] sm:$0xf0] %v405_v38  ;;  %410 = vst [vmem:[#allocation2 + $0x8] sm:$0xf0] %v406_v39  ;;  %v455_v44 = vmul.f32 %v448_v35, %v441_v43  ;;  %v456_v45 = vmul.f32 %v452_v36, %v440_v42  ;;  %v568_v42 = vrot.slane %v1040_v28, %v1423_v22 }
 0x140   : > { %v459_v49 = vrot.slane %v455_v44, 4  ;;  %v460_v50 = vrot.slane %v456_v45, 4  ;;  %v359_v51 = vpop.permute.xlu1 %358  ;;  %v468_v54 = vpop.permute.xlu0 %467 }
 0x141   : > { %v363_v52 = vsel %vm362_vm2, %v357_v29, %v359_v51  ;;  %v364_v53 = vsel %vm362_vm2, %v359_v51, %v357_v29 }
 0x142   : > { %463 = vst [vmem:[#allocation2 + $0x10] sm:$0xf0] %v459_v49  ;;  %464 = vst [vmem:[#allocation2 + $0x18] sm:$0xf0] %v460_v50  ;;  %v377_v55 = vmul.f32 %v370_v46, %v364_v53  ;;  %v378_v56 = vmul.f32 %v374_v47, %v363_v52 }
 0x144   : > { %379 = vst [vmem:[#allocation2] sm:$0xf] %v377_v55  ;;  %380 = vst [vmem:[#allocation2 + $0x8] sm:$0xf] %v378_v56  ;;  %v414_v60 = vpop.permute.xlu1 %413  ;;  %v522_v4 = vpop.permute.xlu0 %521 }
 0x145   : > { %v416_v61 = vsel %vm415_vm3, %v412_v40, %v414_v60  ;;  %v417_v62 = vsel %vm415_vm3, %v414_v60, %v412_v40  ;;  %v575_v60 = vld [vmem:[%s1660_s2] sm:$0x3] }
 0x146   : > { %v431_v63 = vmul.f32 %v424_v57, %v417_v62  ;;  %v432_v0 = vmul.f32 %v428_v58, %v416_v61 }
 0x148   : > { %433 = vst [vmem:[#allocation2 + $0x10] sm:$0xf] %v431_v63  ;;  %434 = vst [vmem:[#allocation2 + $0x18] sm:$0xf] %v432_v0  ;;  %v470_v5 = vpop.permute.xlu1 %469  ;;  %v498_v19 = vpop.permute.xlu0 %497 }
 0x149   : > { %v472_v6 = vsel %vm471_vm4, %v468_v54, %v470_v5  ;;  %v473_v7 = vsel %vm471_vm4, %v470_v5, %v468_v54 }
 0x14a   : > { %v487_v8 = vmul.f32 %v480_v1, %v472_v6  ;;  %v488_v10 = vmul.f32 %v484_v2, %v473_v7 }
 0x14b   : > { %v577_v27 = vld [vmem:[#allocation2 + $0x8] sm:$0xff]  ;;  %v576_v30 = vld [vmem:[#allocation2] sm:$0xff] }
 0x14c   : > { %v491_v14 = vrot.slane %v487_v8, 4  ;;  %v492_v15 = vrot.slane %v488_v10, 4  ;;  %v524_v16 = vpop.permute.xlu1 %523  ;;  %v552_v43 = vpop.permute.xlu0 %551  ;;  %v1043_v10 = vld [vmem:[%s1658_s0 + $0x2] sm:$0x3] }
 0x14d   : > { %v526_v17 = vsel %vm525_vm5, %v522_v4, %v524_v16  ;;  %v527_v18 = vsel %vm525_vm5, %v524_v16, %v522_v4 }
 0x14e   : > { %495 = vst [vmem:[#allocation2 + $0x20] sm:$0xf0] %v491_v14  ;;  %496 = vst [vmem:[#allocation2 + $0x28] sm:$0xf0] %v492_v15  ;;  %v541_v23 = vmul.f32 %v534_v11, %v526_v17  ;;  %v542_v24 = vmul.f32 %v538_v12, %v527_v18  ;;  %v695_v11 = vrot.slane %v1043_v10, %v1421_v21  ;;  %v1045_v14 = vld [vmem:[%s1658_s0 + $0x6] sm:$0x3] }
 0x14f   : > { %v579_v29 = vld [vmem:[#allocation2 + $0x18] sm:$0xff]  ;;  %v578_v31 = vld [vmem:[#allocation2 + $0x10] sm:$0xff]  ;;  %v699_v12 = vrot.slane %v1043_v10, %v1423_v22 }
 0x150   : > { %v545_v32 = vrot.slane %v541_v23, 4  ;;  %v546_v33 = vrot.slane %v542_v24, 4  ;;  %v500_v34 = vpop.permute.xlu1 %499  ;;  %v587_v35 = vpack.c.bf16 %v579_v29, %v577_v27  ;;  %v586_v36 = vpack.c.bf16 %v578_v31, %v576_v30 }
 0x151   : > { %v502_v37 = vsel %vm501_vm6, %v498_v19, %v500_v34  ;;  %v503_v38 = vsel %vm501_vm6, %v500_v34, %v498_v19  ;;  %v745_v23 = vrot.slane %v1045_v14, %v1421_v21  ;;  %v749_v24 = vrot.slane %v1045_v14, %v1423_v22  ;;  %v1049_v14 = vld [vmem:[%s1658_s0 + $0x10] sm:$0x3] }
 0x152   : > { %549 = vst [vmem:[#allocation2 + $0x30] sm:$0xf0] %v545_v32  ;;  %550 = vst [vmem:[#allocation2 + $0x38] sm:$0xf0] %v546_v33  ;;  %v517_v39 = vmul.f32 %v510_v25, %v502_v37  ;;  %v518_v40 = vmul.f32 %v514_v26, %v503_v38  ;;  %603 = vmatprep.subr.bf16.mxu0 %v587_v35  ;;  %v668_v26 = vld [vmem:[%s1658_s0] sm:$0x3] }
 0x153   : > { %604 = vmatpush1.bf16.msra.mxu0 %v586_v36  ;;  %v673_v34 = vrot.slane %v668_v26, %v1421_v21  ;;  %v677_v35 = vrot.slane %v668_v26, %v1423_v22  ;;  %v1044_v37 = vld [vmem:[%s1658_s0 + $0x4] sm:$0x3] }
 0x154   : > { %519 = vst [vmem:[#allocation2 + $0x30] sm:$0xf] %v517_v39  ;;  %520 = vst [vmem:[#allocation2 + $0x38] sm:$0xf] %v518_v40  ;;  %v554_v44 = vpop.permute.xlu1 %553 }
 0x155   : > { %v556_v45 = vsel %vm555_vm7, %v552_v43, %v554_v44  ;;  %v557_v46 = vsel %vm555_vm7, %v554_v44, %v552_v43  ;;  %v581_v49 = vld [vmem:[#allocation2 + $0x28] sm:$0xff]  ;;  %v580_v51 = vld [vmem:[#allocation2 + $0x20] sm:$0xff] }
 0x156   : > { %v571_v47 = vmul.f32 %v564_v41, %v556_v45  ;;  %v572_v48 = vmul.f32 %v568_v42, %v557_v46  ;;  %v723_v45 = vrot.slane %v1044_v37, %v1421_v21  ;;  %v727_v46 = vrot.slane %v1044_v37, %v1423_v22 }
 0x158   : > { %573 = vst [vmem:[#allocation2 + $0x40] sm:$0xf] %v571_v47  ;;  %574 = vst [vmem:[#allocation2 + $0x48] sm:$0xf] %v572_v48  ;;  %v1046_v48 = vld [vmem:[%s1658_s0 + $0xa] sm:$0x3] }
 0x15b   : > { %v583_v50 = vld [vmem:[#allocation2 + $0x38] sm:$0xff]  ;;  %v582_v52 = vld [vmem:[#allocation2 + $0x30] sm:$0xff] }
 0x15c   : > { %v589_v53 = vpack.c.bf16 %v583_v50, %v581_v49  ;;  %v588_v54 = vpack.c.bf16 %v582_v52, %v580_v51 }
 0x15d   : > { %v650_v62 = vpop.permute.xlu0 %649 }
 0x15e   : > { %605 = vmatprep.subr.bf16.mxu0 %v589_v53 }
 0x15f   : > { %606 = vmatpush1.bf16.msra.mxu0 %v588_v54  ;;  %v585_v55 = vld [vmem:[#allocation2 + $0x48] sm:$0xf]  ;;  %v584_v56 = vld [vmem:[#allocation2 + $0x40] sm:$0xf]  ;;  %v775_v54 = vrot.slane %v1046_v48, %v1421_v21 }
 0x160   : > { %v591_v57 = vpack.c.bf16 %v585_v55, %v585_v55  ;;  %v590_v58 = vpack.c.bf16 %v584_v56, %v584_v56  ;;  %v779_v55 = vrot.slane %v1046_v48, %v1423_v22  ;;  %v883_v48 = vcombine.high %v1394_v9, %v1394_v9 }
 0x162   : > { %1041 = vmatprep.subr.msk.bf16.mxu0 %vm596_vm8, %v591_v57  ;;  %v598_v59 = vsel %vm596_vm8, %v590_v58, 0  ;;  %v1048_v57 = vld [vmem:[%s1658_s0 + $0xe] sm:$0x3] }
 0x163   : > { %608 = vmatpush1.bf16.msra.mxu0 %v598_v59 }
 0x165   : > { %v658_v3 = vpop.permute.xlu1 %657 }
 0x166   : > { %1042 = vmatmul.mubr.msk.bf16.vlgmr.msra.gmra.mrb[0].mxu0 %vm592_vm9, %v575_v60 }
 0x239   : > { %v637_v61 = vpop.f32.mrb[0].mxu0 }
 0x23a   : > { %v644_v63 = vmax.f32 %v637_v61, 0.0  ;;  %v639_v0 = vpop.f32.mrb[1].mxu0 }
 0x23b   : > { %v645_v1 = vmax.f32 %v639_v0, 0.0  ;;  %v641_v2 = vpop.f32.mrb[2].mxu0  ;;  %v829_v0 = vrot.slane %v1048_v57, %v1423_v22 }
 0x23c   : > { %v652_v4 = vmul.f32 %v650_v62, %v644_v63  ;;  %v642_v5 = vpop.f32.mrb[3].mxu0  ;;  %v825_v63 = vrot.slane %v1048_v57, %v1421_v21  ;;  %v1047_v2 = vld [vmem:[%s1658_s0 + $0xc] sm:$0x3] }
 0x23d   : > { %v653_v6 = vmul.f32 %v650_v62, %v645_v1 }
 0x23e   : > { %v660_v7 = vadd.f32 %v658_v3, %v652_v4 }
 0x23f   : > { %v661_v8 = vadd.f32 %v658_v3, %v653_v6 }
 0x240   : > { %762 = vst [vmem:[#allocation2 + $0x20] sm:$0xf] %v660_v7  ;;  %684 = vrot.lane.b32.xlu0 %v660_v7, %s1220_s19 }
 0x241   : > { %763 = vst [vmem:[#allocation2 + $0x28] sm:$0xf] %v661_v8  ;;  %686 = vrot.lane.b32.xlu1 %v661_v8, %s1220_s19  ;;  %s941_s19 = scalar_lea.sflag [#allocation5], %s1378_s13 }
 0x244   : > { %734 = vrot.lane.b32.xlu0 %v660_v7, %s1219_s16 }
 0x245   : > { %736 = vrot.lane.b32.xlu1 %v661_v8, %s1219_s16  ;;  %s1614_s16 = scalar_lea.hbm %s1666_s8, %s1058_s21 }
 0x248   : > { %662 = vrot.lane.b32.xlu0 %v660_v7, %s1221_s25 }
 0x249   : > { %664 = vrot.lane.b32.xlu1 %v661_v8, %s1221_s25  ;;  %s1227_s25 = smov [#allocation6]  }
 0x24c   : > { %712 = vrot.lane.b32.xlu0 %v660_v7, %s1222_s15 }
 0x24d   : > { %714 = vrot.lane.b32.xlu1 %v661_v8, %s1222_s15  ;;  %s1152_s15 = sshll.u32 %s1227_s25, 4  ;;  %s1153_s15 = int_to_ptr.vmem [resolvable:$false] %s1152_s15 }
 0x24e   : > { %p1155_p7 = scmp.lt.s32.totalorder %s1616_s22, %s1153_s15 }
 0x250   : > { %764 = vrot.lane.b32.xlu0 %v660_v7, %s1680_s12 }
 0x251   : > { %766 = vrot.lane.b32.xlu1 %v661_v8, %s1680_s12 }
 0x254   : > { %814 = vrot.lane.b32.xlu0 %v660_v7, %s1681_s23 }
 0x255   : > { %816 = vrot.lane.b32.xlu1 %v661_v8, %s1681_s23 }
 0x258   : > { %792 = vrot.lane.b32.xlu0 %v660_v7, %s1225_s10 }
 0x259   : > { %794 = vrot.lane.b32.xlu1 %v661_v8, %s1225_s10  ;;  %s1154_s10 = scalar_lea.vmem %s1153_s15, 256 }
 0x25a   : > { %p1156_p10 = scmp.lt.s32.totalorder %s1154_s10, %s1148_s9 }
 0x25c   : > { %842 = vrot.lane.b32.xlu0 %v660_v7, %s1226_s24  ;;  %p1157_p2 = por %p1156_p10, %p1155_p7 }
 0x25d   : > { %844 = vrot.lane.b32.xlu1 %v661_v8, %s1226_s24 }
 0x25e   : > { %p1158_p4 = pnand %p1157_p2, %p1151_p13 }
 0x2b2   : > { %v685_v13 = vpop.permute.xlu0 %684 }
 0x2b3   : > { %v687_v15 = vpop.permute.xlu1 %686 }
 0x2b4   : > { %v688_v16 = vsel %vm385_vm0, %v685_v13, %v687_v15  ;;  %v689_v17 = vsel %vm385_vm0, %v687_v15, %v685_v13 }
 0x2b5   : > { %v702_v18 = vmul.f32 %v695_v11, %v689_v17  ;;  %v703_v19 = vmul.f32 %v699_v12, %v688_v16  ;;  %v803_v11 = vrot.slane %v1047_v2, %v1421_v21  ;;  %v807_v12 = vrot.slane %v1047_v2, %v1423_v22 }
 0x2b6   : > { %v735_v25 = vpop.permute.xlu0 %734 }
 0x2b7   : > { %v706_v27 = vrot.slane %v702_v18, 4  ;;  %v707_v28 = vrot.slane %v703_v19, 4  ;;  %v737_v29 = vpop.permute.xlu1 %736 }
 0x2b8   : > { %v738_v30 = vsel %vm439_vm1, %v735_v25, %v737_v29  ;;  %v739_v31 = vsel %vm439_vm1, %v737_v29, %v735_v25 }
 0x2b9   : > { %710 = vst [vmem:[#allocation2] sm:$0xf0] %v706_v27  ;;  %711 = vst [vmem:[#allocation2 + $0x8] sm:$0xf0] %v707_v28  ;;  %v752_v32 = vmul.f32 %v745_v23, %v739_v31  ;;  %v753_v33 = vmul.f32 %v749_v24, %v738_v30  ;;  %v853_v31 = vrot.slane %v1049_v14, %v1421_v21 }
 0x2ba   : > { %v663_v36 = vpop.permute.xlu0 %662 }
 0x2bb   : > { %v756_v38 = vrot.slane %v752_v32, 4  ;;  %v757_v39 = vrot.slane %v753_v33, 4  ;;  %v665_v40 = vpop.permute.xlu1 %664  ;;  %v857_v32 = vrot.slane %v1049_v14, %v1423_v22 }
 0x2bc   : > { %v666_v41 = vsel %vm362_vm2, %v663_v36, %v665_v40  ;;  %v667_v42 = vsel %vm362_vm2, %v665_v40, %v663_v36 }
 0x2bd   : > { %760 = vst [vmem:[#allocation2 + $0x10] sm:$0xf0] %v756_v38  ;;  %761 = vst [vmem:[#allocation2 + $0x18] sm:$0xf0] %v757_v39  ;;  %v680_v43 = vmul.f32 %v673_v34, %v667_v42  ;;  %v681_v44 = vmul.f32 %v677_v35, %v666_v41 }
 0x2be   : > { %v713_v47 = vpop.permute.xlu0 %712 }
 0x2bf   : > { %682 = vst [vmem:[#allocation2] sm:$0xf] %v680_v43  ;;  %683 = vst [vmem:[#allocation2 + $0x8] sm:$0xf] %v681_v44  ;;  %v715_v49 = vpop.permute.xlu1 %714 }
 0x2c0   : > { %v716_v50 = vsel %vm415_vm3, %v713_v47, %v715_v49  ;;  %v717_v51 = vsel %vm415_vm3, %v715_v49, %v713_v47  ;;  %v864_v47 = vld [vmem:[%s1661_s3] sm:$0x3] }
 0x2c1   : > { %v730_v52 = vmul.f32 %v723_v45, %v717_v51  ;;  %v731_v53 = vmul.f32 %v727_v46, %v716_v50 }
 0x2c2   : > { %v765_v56 = vpop.permute.xlu0 %764 }
 0x2c3   : > { %732 = vst [vmem:[#allocation2 + $0x10] sm:$0xf] %v730_v52  ;;  %733 = vst [vmem:[#allocation2 + $0x18] sm:$0xf] %v731_v53  ;;  %v767_v58 = vpop.permute.xlu1 %766 }
 0x2c4   : > { %v768_v59 = vsel %vm471_vm4, %v765_v56, %v767_v58  ;;  %v769_v60 = vsel %vm471_vm4, %v767_v58, %v765_v56 }
 0x2c5   : > { %v782_v61 = vmul.f32 %v775_v54, %v768_v59  ;;  %v783_v62 = vmul.f32 %v779_v55, %v769_v60 }
 0x2c6   : > { %v815_v1 = vpop.permute.xlu0 %814  ;;  %v866_v13 = vld [vmem:[#allocation2 + $0x8] sm:$0xff]  ;;  %v865_v17 = vld [vmem:[#allocation2] sm:$0xff] }
 0x2c7   : > { %v786_v3 = vrot.slane %v782_v61, 4  ;;  %v787_v4 = vrot.slane %v783_v62, 4  ;;  %v817_v5 = vpop.permute.xlu1 %816 }
 0x2c8   : > { %v818_v6 = vsel %vm525_vm5, %v815_v1, %v817_v5  ;;  %v819_v7 = vsel %vm525_vm5, %v817_v5, %v815_v1 }
 0x2c9   : > { %790 = vst [vmem:[#allocation2 + $0x20] sm:$0xf0] %v786_v3  ;;  %791 = vst [vmem:[#allocation2 + $0x28] sm:$0xf0] %v787_v4  ;;  %v832_v8 = vmul.f32 %v825_v63, %v818_v6  ;;  %v833_v10 = vmul.f32 %v829_v0, %v819_v7 }
 0x2ca   : > { %v793_v15 = vpop.permute.xlu0 %792  ;;  %v868_v16 = vld [vmem:[#allocation2 + $0x18] sm:$0xff]  ;;  %v867_v18 = vld [vmem:[#allocation2 + $0x10] sm:$0xff] }
 0x2cb   : > { %v836_v19 = vrot.slane %v832_v8, 4  ;;  %v837_v23 = vrot.slane %v833_v10, 4  ;;  %v795_v24 = vpop.permute.xlu1 %794  ;;  %v876_v25 = vpack.c.bf16 %v868_v16, %v866_v13  ;;  %v875_v26 = vpack.c.bf16 %v867_v18, %v865_v17 }
 0x2cc   : > { %v796_v27 = vsel %vm501_vm6, %v793_v15, %v795_v24  ;;  %v797_v28 = vsel %vm501_vm6, %v795_v24, %v793_v15 }
 0x2cd   : > { %840 = vst [vmem:[#allocation2 + $0x30] sm:$0xf0] %v836_v19  ;;  %841 = vst [vmem:[#allocation2 + $0x38] sm:$0xf0] %v837_v23  ;;  %v810_v29 = vmul.f32 %v803_v11, %v796_v27  ;;  %v811_v30 = vmul.f32 %v807_v12, %v797_v28  ;;  %894 = vmatprep.subr.bf16.mxu1 %v876_v25 }
 0x2ce   : > { %v843_v33 = vpop.permute.xlu0 %842  ;;  %895 = vmatpush1.bf16.msra.mxu1 %v875_v26 }
 0x2cf   : > { %812 = vst [vmem:[#allocation2 + $0x30] sm:$0xf] %v810_v29  ;;  %813 = vst [vmem:[#allocation2 + $0x38] sm:$0xf] %v811_v30  ;;  %v845_v34 = vpop.permute.xlu1 %844 }
 0x2d0   : > { %v846_v35 = vsel %vm555_vm7, %v843_v33, %v845_v34  ;;  %v847_v36 = vsel %vm555_vm7, %v845_v34, %v843_v33  ;;  %v870_v39 = vld [vmem:[#allocation2 + $0x28] sm:$0xff]  ;;  %v869_v21 = vld [vmem:[#allocation2 + $0x20] sm:$0xff] }
 0x2d1   : > { %v860_v37 = vmul.f32 %v853_v31, %v846_v35  ;;  %v861_v38 = vmul.f32 %v857_v32, %v847_v36 }
 0x2d3   : > { %862 = vst [vmem:[#allocation2 + $0x40] sm:$0xf] %v860_v37  ;;  %863 = vst [vmem:[#allocation2 + $0x48] sm:$0xf] %v861_v38 }
 0x2d6   : > { %v872_v40 = vld [vmem:[#allocation2 + $0x38] sm:$0xff]  ;;  %v871_v41 = vld [vmem:[#allocation2 + $0x30] sm:$0xff] }
 0x2d7   : > { %v878_v22 = vpack.c.bf16 %v872_v40, %v870_v39  ;;  %v877_v42 = vpack.c.bf16 %v871_v41, %v869_v21 }
 0x2d9   : > { %896 = vmatprep.subr.bf16.mxu1 %v878_v22 }
 0x2da   : > { %897 = vmatpush1.bf16.msra.mxu1 %v877_v42  ;;  %v874_v43 = vld [vmem:[#allocation2 + $0x48] sm:$0xf]  ;;  %v873_v44 = vld [vmem:[#allocation2 + $0x40] sm:$0xf] }
 0x2db   : > { %v880_v45 = vpack.c.bf16 %v874_v43, %v874_v43  ;;  %v879_v46 = vpack.c.bf16 %v873_v44, %v873_v44 }
 0x2dd   : > { %1050 = vmatprep.subr.msk.bf16.mxu1 %vm596_vm8, %v880_v45  ;;  %v889_v20 = vsel %vm596_vm8, %v879_v46, 0 }
 0x2de   : > { %899 = vmatpush1.bf16.msra.mxu1 %v889_v20 }
 0x2e1   : > { %1051 = vmatmul.mubr.msk.bf16.vlgmr.msra.gmra.mrb[0].mxu1 %vm592_vm9, %v864_v47 }
 0x3b4   : > { %v928_v49 = vpop.f32.mrb[0].mxu1 }
 0x3b5   : > { %v929_v50 = vadd.f32 %v928_v49, %v1394_v9  ;;  %v930_v51 = vpop.f32.mrb[1].mxu1 }
 0x3b6   : > { %v931_v52 = vadd.f32 %v930_v51, %v883_v48  ;;  %v932_v53 = vpop.f32.mrb[2].mxu1 }
 0x3b7   : > { %v933_v54 = vpop.f32.mrb[3].mxu1 }
 0x3b8   : > { %v937_v55 = vcombine.low %v929_v50, %v931_v52 }
 0x3ba   : > { %939 = vst [vmem:[%s321_s20] sm:$0xff] %v937_v55 }
 0x3bb   : > { %1161 = shalt.err (!%p1158_p4)
}
 0x3bc   : > { %s1162_s13 = scalar_lea.hbm %s1614_s16, 128  ;;  %s1166_s26 = scalar_lea.hbm %s1666_s8, 256 }
 0x3bd   : > { %p1163_p5 = scmp.ne.s32.totalorder %s1614_s16, %s1162_s13  ;;  %p1167_p0 = scmp.lt.u32.totalorder %s1614_s16, %s1666_s8 }
 0x3be   : > { %p1168_p1 = scmp.lt.u32.totalorder %s1166_s26, %s1162_s13  ;;  %p1170_p6 = scmp.lt.u32.totalorder %s1162_s13, %s1614_s16 }
 0x3bf   : > { %p1164_p8 = pnand %p1163_p5, %p1683_p11 }
 0x3c0   : > { %p1169_p3 = por %p1168_p1, %p1167_p0 }
 0x3c1   : > { %p1165_p9 = pneg %p1164_p8 }
 0x3c2   : > { %p1171_p12 = por %p1170_p6, %p1169_p3 }
 0x3c4   : > { %p1172_p13 = pnand %p1171_p12, %p1165_p9 }
 0x3c6   : > { %1175 = shalt.err (!%p1172_p13)
}
 0x3c7   : > { %1061 = dma.vmem_to_hbm [thread:$0]  (%p1683_p11), %s1616_s22, 128, %s1614_s16, %s941_s19  }
 0x3c8 PF: > { %s967_s23 = sand.u32 1, %s1202_s27   ;;  %p1684_p7 = scmp.ne.s32.totalorder %s1676_s18, 0 }
 0x3c9   : > { %p1685_p10 = scmp.ge.s32.totalorder %s1214_s30, 2  ;;  %s968_s9 = scalar_lea.sflag [#allocation5], %s967_s23 }
 0x3cb   : > { %p1068_p2 = pnand %p1685_p10, %p1684_p7 }
 0x3cd   : > { %1197 = dma.done.wait (!%p1068_p2), %s968_s9, 128  }
 0x3ce   : > { %1199 = vsyncadd (!%p1068_p2), %s968_s9, 4294967168  ;;  %p21_p4 = scmp.ge.s32.totalorder %s1298_s11, 4   ;;  %s1686_s27 = smov %s1206_s28 }
 0x3cf   : > { %s1687_s28 = smov %s1210_s29  ;;  %s1688_s29 = smov %s1310_s14 }
 0x3d0   : > { %s1689_s30 = smov %s1298_s11  ;;  %23 = sbr.rel (!%p21_p4) target bundleno = 5 (0x5), region = 104 }
 0x3d7   :  { %973 = vsyncpa [#allocation4], 1 }
 0x3d8   :  { %975 = vsyncpa [#allocation4 + $0x1], 1 }
 0x3d9   :  { %976 = vsyncpa [#allocation5], 1 }
 0x3da   :  { %978 = vsyncpa [#allocation5 + $0x1], 1 }

</bundles_post_ra>
